<compile_context>
chip_gen: v7x
topology: tpu7x:2x2x1
jax: 0.10.0
libtpu: 0.0.40
codegen_flags: <defaults>
</compile_context>

<pallas_src>
import functools

import jax
import jax.numpy as jnp
from jax.experimental import pallas as pl
from jax.experimental.pallas import tpu as pltpu


_LANES = 128          # vreg lane width (fast axis)
_SUBLANES = 8         # vreg sublane height
_TILE_ROWS = 4096     # rows per grid step: 4096*128*4B = 2 MiB / f32 input buffer
                      # -> 2 inputs x 2 pipeline buffers = 8 MiB VMEM (OK on v5e).
_NUM_CORES = 2        # leading "parallel" grid axis: shards the reduction across
                      # both TensorCores on v7x; serial & harmless on v5e/v6e.
# Fixed small-input cutoff (decoupled from _TILE_ROWS): below this the
# pallas_call launch + DMA setup dominates, so plain jnp (XLA-fused) wins.
_PALLAS_MIN_ELEMS = 64 * 1024


def _round_up(x, m):
    return -(-x // m) * m


def _mse_partial_kernel(pred_ref, gt_ref, out_ref, *, rows, tile_rows,
                        steps_per_core, needs_mask):
    """Accumulate a per-core partial sum of (pred - gt)^2 into an (8,128) block."""
    c = pl.program_id(0)          # core / "parallel" axis
    i = pl.program_id(1)          # reduction / "arbitrary" axis

    @pl.when(i == 0)
    def _init():
        out_ref[...] = jnp.zeros_like(out_ref)

    # Cast in-kernel (VPU work hidden under DMA) so sub-f32 inputs are read
    # from HBM at their native width.
    diff = pred_ref[...].astype(jnp.float32) - gt_ref[...].astype(jnp.float32)
    sq = diff * diff

    if needs_mask:
        # Grid over-covers the (rows, 128) array: rows past the end of the
        # array (and fully-clamped duplicate blocks) hold unspecified garbage
        # and MUST be masked before accumulation.
        row_in_tile = jax.lax.broadcasted_iota(jnp.int32, (tile_rows, _LANES), 0)
        global_row = (c * steps_per_core + i) * tile_rows + row_in_tile
        sq = jnp.where(global_row < rows, sq, 0.0)

    # Fold the tile into the resident (8, 128) output/accumulator block with
    # pure VPU adds; the reshape only regroups whole (8, 128) sub-tiles.
    out_ref[...] += jnp.sum(
        sq.reshape(tile_rows // _SUBLANES, _SUBLANES, _LANES), axis=0)


def _mse_sum_pallas(pred, gt):
    """Lane-dense, tiled Pallas sum of squared differences (f32 scalar)."""
    total = pred.size
    itemsize = pred.dtype.itemsize

    pred_f = pred.reshape(-1)          # free reshape, native dtype
    gt_f = gt.reshape(-1)

    rows = -(-total // _LANES)
    pad = rows * _LANES - total
    if pad:
        # TODO(synk): this <=127-element pad still costs one extra read+write
        # pass over each input (a non-multiple-of-128 buffer cannot be viewed
        # as (rows, 128) for free); it is skipped whenever size % 128 == 0.
        pred_f = jnp.pad(pred_f, (0, pad))
        gt_f = jnp.pad(gt_f, (0, pad))
    pred2d = pred_f.reshape(rows, _LANES)
    gt2d = gt_f.reshape(rows, _LANES)

    if rows >= _TILE_ROWS:
        tile_rows = _TILE_ROWS
    else:
        # Multiple of 32 keeps the block legal for f32/bf16/int8 sublane packing.
        tile_rows = _round_up(rows, 32)
    steps = -(-rows // tile_rows)
    steps_per_core = -(-steps // _NUM_CORES)
    needs_mask = (_NUM_CORES * steps_per_core * tile_rows != rows)

    def in_map(c, i):
        # Clamp fully-out-of-range block indices (when `steps` doesn't split
        # evenly across cores); their rows are masked to zero in the kernel.
        return (jnp.minimum(c * steps_per_core + i, steps - 1), 0)

    kernel = functools.partial(
        _mse_partial_kernel, rows=rows, tile_rows=tile_rows,
        steps_per_core=steps_per_core, needs_mask=needs_mask)

    partials = pl.pallas_call(
        kernel,
        out_shape=jax.ShapeDtypeStruct((_NUM_CORES * _SUBLANES, _LANES),
                                       jnp.float32),
        grid=(_NUM_CORES, steps_per_core),
        in_specs=[
            pl.BlockSpec((tile_rows, _LANES), in_map),
            pl.BlockSpec((tile_rows, _LANES), in_map),
        ],
        out_specs=pl.BlockSpec((_SUBLANES, _LANES), lambda c, i: (c, 0)),
        compiler_params=pltpu.CompilerParams(
            dimension_semantics=("parallel", "arbitrary")),
        cost_estimate=pl.CostEstimate(
            flops=3 * total,
            transcendentals=0,
            bytes_accessed=2 * rows * _LANES * itemsize
                           + _NUM_CORES * _SUBLANES * _LANES * 4),
    )(pred2d, gt2d)

    # Tiny (16, 128) cross-lane reduce of the per-core partial accumulators.
    return jnp.sum(partials)


def mse_loss(pred, gt, reduction="mean", force_pallas=False):
    """Pallas equivalent of nn.MSELoss(reduction=reduction)(pred, gt).

    pred, gt: equal-shaped arrays (the module uses (N, 4) xywh boxes).
    Returns a 0-d float32 array.
    """
    assert pred.shape == gt.shape, "pred and gt must have the same shape"
    total = pred.size
    if reduction == "mean":
        scale = 1.0 / float(total)
    elif reduction == "sum":
        scale = None
    else:
        raise NotImplementedError(f"reduction={reduction!r}")
    # TODO(synk): reduction='none' (elementwise output) not wired up; the
    # reference module is used with 'mean'.

    if not force_pallas and total < _PALLAS_MIN_ELEMS:
        # Tiny inputs: launch overhead dominates -> plain jnp (XLA fuses it).
        diff = pred.astype(jnp.float32) - gt.astype(jnp.float32)
        s = jnp.sum(diff * diff)
    else:
        s = _mse_sum_pallas(pred, gt)
    return s if scale is None else s * scale


class MSELossPallas:
    """Mirror of the PyTorch MSELoss module's forward semantics."""

    def __init__(self, reduction="mean", force_pallas=False):
        self.reduction = reduction
        self.force_pallas = force_pallas

    def __call__(self, pred, gt):
        loss = mse_loss(pred, gt, reduction=self.reduction,
                        force_pallas=self.force_pallas)
        return (loss, jnp.zeros_like(loss), loss)


if __name__ == "__main__":
    key = jax.random.PRNGKey(0)
    k1, k2, k3, k4, k5, k6 = jax.random.split(key, 6)

    # 1) Module-sized input (N boxes, 4 coords), forced through the Pallas
    #    kernel so the kernel itself is exercised even at tiny N.
    N = 8
    pred_s = jax.random.normal(k1, (N, 4), dtype=jnp.float32)
    gt_s = jax.random.normal(k2, (N, 4), dtype=jnp.float32)

    module = MSELossPallas(reduction="mean", force_pallas=True)
    loss, zero, loss2 = module(pred_s, gt_s)
    jax.block_until_ready((loss, zero, loss2))

    ref = jnp.mean((pred_s - gt_s) ** 2)
    assert jnp.allclose(loss, ref, rtol=1e-6, atol=1e-6), (loss, ref)
    assert jnp.allclose(loss2, ref, rtol=1e-6, atol=1e-6)
    assert zero == 0.0

    # 2) Larger batch: zero-pad-free path (total % 128 == 0), single grid step.
    N2 = 20000
    pred_l = jax.random.normal(k3, (N2, 4), dtype=jnp.float32)
    gt_l = jax.random.normal(k4, (N2, 4), dtype=jnp.float32)
    loss_l = mse_loss(pred_l, gt_l, reduction="mean")
    jax.block_until_ready(loss_l)
    ref_l = jnp.mean((pred_l - gt_l) ** 2)
    assert jnp.allclose(loss_l, ref_l, rtol=1e-5, atol=1e-6), (loss_l, ref_l)

    # 3) Large ragged batch: multi-step accumulation, both-"core" split,
    #    clamped trailing block, and in-kernel tail masking.
    N3 = 270000  # 1,080,000 elems -> rows=8438, tiles of 4096, grid (2, 2)
    pred_h = jax.random.normal(k5, (N3, 4), dtype=jnp.float32)
    gt_h = jax.random.normal(k6, (N3, 4), dtype=jnp.float32)
    loss_h = mse_loss(pred_h, gt_h, reduction="mean")
    jax.block_until_ready(loss_h)
    ref_h = jnp.mean((pred_h - gt_h) ** 2)
    assert jnp.allclose(loss_h, ref_h, rtol=1e-4, atol=1e-6), (loss_h, ref_h)

    # 4) Default small-N path (plain-jnp fast path, the real ReITrack use case).
    loss_fast = mse_loss(pred_s, gt_s)
    jax.block_until_ready(loss_fast)
    assert jnp.allclose(loss_fast, ref, rtol=1e-6, atol=1e-6)

    print("KERNEL_OK")
</pallas_src>

<mosaic_0001>
module attributes {stable_mosaic.version = 11 : i64} {
  func.func @_mse_partial_kernel(%arg0: i32, %arg1: i32, %arg2: memref<32x128xf32, #tpu.memory_space<vmem>>, %arg3: memref<32x128xf32, #tpu.memory_space<vmem>>, %arg4: memref<8x128xf32, #tpu.memory_space<vmem>>) attributes {dimension_semantics = [#tpu.dimension_semantics<parallel>, #tpu.dimension_semantics<arbitrary>], iteration_bounds = array<i64: 2, 1>, scalar_prefetch = 0 : i64, scratch_operands = 0 : i64, tpu.core_type = #tpu.core_type<tc>, window_params = [{transform_indices = @transform_0, window_bounds = array<i64: 32, 128>}, {transform_indices = @transform_1, window_bounds = array<i64: 32, 128>}, {transform_indices = @transform_2, window_bounds = array<i64: 8, 128>}]} {
    %c0_i32 = arith.constant 0 : i32
    %0 = arith.cmpi eq, %arg1, %c0_i32 : i32
    %1 = arith.extui %0 : i1 to i32
    %c0_i32_0 = arith.constant 0 : i32
    %2 = arith.cmpi ne, %1, %c0_i32_0 : i32
    scf.if %2 {
      %cst_10 = arith.constant 0.000000e+00 : f32
      %22 = vector.broadcast %cst_10 : f32 to vector<8x128xf32>
      %c0_11 = arith.constant 0 : index
      %c0_12 = arith.constant 0 : index
      %23 = vector.load %arg4[%c0_11, %c0_12] : memref<8x128xf32, #tpu.memory_space<vmem>>, vector<8x128xf32>
      tpu.vector_store %arg4[%c0_11, %c0_12], %22 {strides = array<i32>} : memref<8x128xf32, #tpu.memory_space<vmem>>, vector<8x128xf32>,
    } else {
    }
    %c0 = arith.constant 0 : index
    %c0_1 = arith.constant 0 : index
    %3 = vector.load %arg2[%c0, %c0_1] : memref<32x128xf32, #tpu.memory_space<vmem>>, vector<32x128xf32>
    %c0_2 = arith.constant 0 : index
    %c0_3 = arith.constant 0 : index
    %4 = vector.load %arg3[%c0_2, %c0_3] : memref<32x128xf32, #tpu.memory_space<vmem>>, vector<32x128xf32>
    %5 = arith.subf %3, %4 : vector<32x128xf32>
    %6 = arith.mulf %5, %5 : vector<32x128xf32>
    %7 = tpu.iota {dimensions = array<i32: 0>} : vector<32x128xi32>
    %c1_i32 = arith.constant 1 : i32
    %8 = arith.muli %arg0, %c1_i32 : i32
    %9 = arith.addi %8, %arg1 : i32
    %c32_i32 = arith.constant 32 : i32
    %10 = arith.muli %9, %c32_i32 : i32
    %11 = vector.broadcast %10 : i32 to vector<32x128xi32>
    %12 = arith.addi %11, %7 : vector<32x128xi32>
    %c1_i32_4 = arith.constant 1 : i32
    %13 = vector.broadcast %c1_i32_4 : i32 to vector<32x128xi32>
    %14 = arith.cmpi slt, %12, %13 : vector<32x128xi32>
    %cst = arith.constant 0.000000e+00 : f32
    %15 = vector.broadcast %cst : f32 to vector<32x128xf32>
    %16 = arith.select %14, %6, %15 : vector<32x128xi1>, vector<32x128xf32>
    %c0_5 = arith.constant 0 : index
    %c0_6 = arith.constant 0 : index
    %17 = vector.load %arg4[%c0_5, %c0_6] : memref<8x128xf32, #tpu.memory_space<vmem>>, vector<8x128xf32>
    %18 = vector.shape_cast %16 : vector<32x128xf32> to vector<4x8x128xf32>
    %cst_7 = arith.constant dense<0.000000e+00> : vector<8x128xf32>
    %19 = vector.multi_reduction <add>, %18, %cst_7 [0] : vector<4x8x128xf32> to vector<8x128xf32>
    %20 = arith.addf %17, %19 : vector<8x128xf32>
    %c0_8 = arith.constant 0 : index
    %c0_9 = arith.constant 0 : index
    %21 = vector.load %arg4[%c0_8, %c0_9] : memref<8x128xf32, #tpu.memory_space<vmem>>, vector<8x128xf32>
    tpu.vector_store %arg4[%c0_8, %c0_9], %20 {strides = array<i32>} : memref<8x128xf32, #tpu.memory_space<vmem>>, vector<8x128xf32>,
    return
  }
  func.func @transform_0(%arg0: i32, %arg1: i32) -> (i32, i32) {
    %c1_i32 = arith.constant 1 : i32
    %0 = arith.muli %arg0, %c1_i32 : i32
    %1 = arith.addi %0, %arg1 : i32
    %c0_i32 = arith.constant 0 : i32
    %2 = arith.minsi %1, %c0_i32 : i32
    %c0_i32_0 = arith.constant 0 : i32
    %c0_i32_1 = arith.constant 0 : i32
    return %2, %c0_i32_0 : i32, i32
  }
  func.func @transform_1(%arg0: i32, %arg1: i32) -> (i32, i32) {
    %c1_i32 = arith.constant 1 : i32
    %0 = arith.muli %arg0, %c1_i32 : i32
    %1 = arith.addi %0, %arg1 : i32
    %c0_i32 = arith.constant 0 : i32
    %2 = arith.minsi %1, %c0_i32 : i32
    %c0_i32_0 = arith.constant 0 : i32
    %c0_i32_1 = arith.constant 0 : i32
    return %2, %c0_i32_0 : i32, i32
  }
  func.func @transform_2(%arg0: i32, %arg1: i32) -> (i32, i32) {
    %c0_i32 = arith.constant 0 : i32
    %c0_i32_0 = arith.constant 0 : i32
    return %arg0, %c0_i32 : i32, i32
  }
}

</mosaic_0001>

<bundles_post_ra>
// kernel: tpu_custom_call.1
= control target key start
LH: loop header
LB: loop body
LE: loop exit
PB: predicated region body
PF: predicated region fallthrough
CT: control target
= control target key end

     0   :  { %7 = vsyncpa [#allocation3], 0  ;;  %s810_s0 = inlined_call_operand.hbm [shape: f32[1,128], index: 0, kind: input, shape index: {}]   ;;  %s811_s1 = inlined_call_operand.vmem [shape: f32[1,128], index: 1, kind: input, shape index: {}]   ;;  %s812_s2 = inlined_call_operand.hbm [shape: f32[16,128], index: 2, kind: output, shape index: {}]  }
   0x1   :  { %9 = vsyncpa [#allocation3 + $0x1], 0 }
   0x2   :  { %10 = vsyncpa [#allocation4], 0 }
   0x3   :  { %12 = vsyncpa [#allocation4 + $0x1], 0  ;;  %s646_s9 = smov 0   ;;  %s648_s10 = smov 0  }
   0x4   :  { %s650_s11 = smov 0   ;;  %s652_s12 = smov 0  }
   0x5   :  { %s654_s13 = smov 0   ;;  %s656_s14 = smov 0  }
   0x6   :  { %s658_s15 = smov 0   ;;  %s660_s16 = smov 0  }
   0x7 LB: > { %s390_s17 = sadd.s32 4294967295, %s625_s16   ;;  %s391_s18 = sadd.s32 4294967294, %s625_s16   ;;  %s625_s16 = sphi %s660_s16, %s18_s16   ;;  %s621_s15 = sphi %s658_s15, %s822_s15   ;;  %s617_s14 = sphi %s656_s14, %s821_s14   ;;  %s613_s13 = sphi %s654_s13, %s800_s13   ;;  %s609_s12 = sphi %s652_s12, %s820_s12   ;;  %s605_s11 = sphi %s650_s11, %s819_s11   ;;  %s601_s10 = sphi %s648_s10, %s818_s10   ;;  %s597_s9 = sphi %s646_s9, %s817_s9  }
   0x8   : > { %s30_s19 = sadd.s32 1, %s621_s15  ;;  %p594_p1 = scmp.ne.s32.totalorder %s613_s13, 0 }
   0x9   : > { %p32_p0 = scmp.ge.s32.totalorder %s30_s19, 2  ;;  %p51_p2 = scmp.eq.s32.totalorder %s625_s16, 0 }
   0xa   : > { %p56_p3 = scmp.ne.s32.totalorder %s613_s13, %s609_s12  ;;  %p57_p5 = scmp.eq.s32.totalorder %s390_s17, 0 }
   0xb   : > { %s824_s19 = smov (%p32_p0, %s30_s19), 0  ;;  %p692_p4 = por %p594_p1, %p51_p2 }
   0xc   : > { %p696_p6 = por %p57_p5, %p56_p3  ;;  %s98_s22 = ssub.s32 %s621_s15, %s824_s19 }
   0xd   : > { %p99_p7 = scmp.eq.s32.totalorder %s98_s22, 0  ;;  %s101_s23 = sadd.s32 1, %s605_s11 }
   0xe   : > { %p111_p8 = scmp.ne.s32.totalorder %s605_s11, %s601_s10  ;;  %p112_p9 = scmp.eq.s32.totalorder %s390_s17, 1 }
   0xf   : > { %s704_s24 = scalar_select %p99_p7, %s605_s11, %s101_s23  }
  0x10   : > { %p117_p10 = scmp.ne.s32.totalorder %s601_s10, %s597_s9  ;;  %p118_p11 = scmp.eq.s32.totalorder %s391_s18, 1 }
  0x11   : > { %p710_p12 = por %p112_p9, %p111_p8  ;;  %p393_p0 = scmp.ge.s32.totalorder %s625_s16, 2 }
  0x12   : > { %p714_p13 = por %p118_p11, %p117_p10 }
  0x13   : > { %134 = sbr.rel (%p393_p0) target bundleno = 53 (0x35), region = 16 }
  0x1a   : > { %137 = sbr.rel (!%p692_p4) target bundleno = 53 (0x35), region = 20 }
  0x21   : > { %151 = vsyncadd [#allocation3], 496  ;;  %s627_s27 = smov [#allocation2]   ;;  %s492_s3 = scalar_lea.hbm %s810_s0, 16 }
  0x22   : > { %s155_s28 = sshll.u32 %s627_s27, 4  ;;  %p493_p1 = scmp.ne.s32.totalorder %s810_s0, %s492_s3  ;;  %s156_s28 = int_to_ptr.vmem [resolvable:$true] %s155_s28 }
  0x23   : > { %p498_p2 = scmp.lt.u32.totalorder %s492_s3, %s492_s3  ;;  %p500_p3 = scmp.lt.u32.totalorder %s492_s3, %s810_s0 }
  0x25   : > { %p501_p5 = por %p500_p3, %p498_p2 }
  0x27   : > { %p502_p7 = pnand %p501_p5, %p493_p1 }
  0x29   : > { %505 = shalt.err (!%p502_p7)
}
  0x2a   : > { %s506_s8 = scalar_lea.vmem %s156_s28, 16  ;;  %s512_s12 = scalar_lea.vmem %s156_s28, 1024 }
  0x2b   : > { %p507_p4 = scmp.ne.s32.totalorder %s156_s28, %s506_s8  ;;  %p513_p8 = scmp.lt.s32.totalorder %s156_s28, %s156_s28 }
  0x2c   : > { %p514_p9 = scmp.lt.s32.totalorder %s512_s12, %s506_s8 }
  0x2e   : > { %p515_p10 = por %p514_p9, %p513_p8 }
  0x30   : > { %p516_p11 = pnand %p515_p10, %p507_p4 }
  0x32   : > { %519 = shalt.err (!%p516_p11)
}
  0x33   : > { %s628_s17 = smov 16   ;;  %s629_s18 = smov 1  }
  0x34   : > { %161 = dma.hbm_to_vmem [thread:$0]  %s810_s0, 16, %s156_s28, [#allocation3], %s628_s17, %s628_s17, %s629_s18  }
  0x35 PF: > { %p399_p1 = scmp.ge.s32.totalorder %s625_s16, 1  ;;  %p181_p2 = scmp.lt.s32.totalorder %s625_s16, 3 }
  0x37   : > { %p182_p3 = pnand %p399_p1, %p181_p2 }
  0x38   : > { %s187_s23 = sand.u32 (!%p182_p3), 1, %s613_s13  }
  0x39   : > { %185 = sbr.rel (%p182_p3) target bundleno = 100 (0x64), region = 28  ;;  %s400_s27 = sshll.u32 (!%p182_p3), %s187_s23, 5 }
  0x3a   : > { %s188_s29 = scalar_lea.sflag (!%p182_p3), [#allocation3], %s187_s23  ;;  %s191_s30 = scalar_lea.vmem (!%p182_p3), [#allocation2], %s400_s27 }
  0x40   : > { %585 = dma.done.wait (%p696_p6), %s188_s29, 512  }
  0x41   : > { %587 = vsyncadd (%p696_p6), %s188_s29, 4294966784  ;;  %p228_p5 = scmp.lt.s32.totalorder %s617_s14, 0  ;;  %v263_v0 = vlaneseq  ;;  %s403_s28 = sshll.u32 %s617_s14, 5  ;;  %v247_v6 = vld [vmem:[%s191_s30] sm:$0xff]  ;;  %v248_v7 = vld [vmem:[%s191_s30 + $0x8] sm:$0xff] }
  0x42   : > { %v270_v4 = vstv %s403_s28  ;;  %v249_v8 = vld [vmem:[%s191_s30 + $0x10] sm:$0xff]  ;;  %v250_v12 = vld [vmem:[%s191_s30 + $0x18] sm:$0xff]  ;;  %s218_s7 = sand.u32 1, %s601_s10   ;;  %s405_s12 = sshll.u32 %s617_s14, 7 }
  0x43   : > { %v264_v1 = vshrl.u32 %v263_v0, 7  ;;  %s229_s3 = scalar_select %p228_p5, %s617_s14, 0 }
  0x44   : > { %s401_s8 = sshll.u32 %s218_s7, 3  ;;  %s755_s23 = scalar_lea.hbm %s812_s2, %s405_s12 }
  0x45   : > { %s402_s4 = sshll.u32 %s229_s3, 5  ;;  %v265_v2 = vadd.s32 8, %v264_v1  ;;  %v266_v3 = vadd.s32 16, %v264_v1  ;;  %v267_v5 = vadd.s32 24, %v264_v1  ;;  %v271_v9 = vadd.s32 %v270_v4, %v264_v1  ;;  %s220_s17 = scalar_lea.vmem [#allocation5], %s401_s8 }
  0x46   : > { %p233_p7 = scmp.lt.s32.totalorder %s402_s4, 0  ;;  %s303_s18 = sshll.u32 %s220_s17, 4  ;;  %s757_s18 = int_to_ptr.vmem [resolvable:$true] %s303_s18 }
  0x47   : > { %v272_v10 = vadd.s32 %v270_v4, %v265_v2  ;;  %v273_v11 = vadd.s32 %v270_v4, %v266_v3  ;;  %v274_v16 = vadd.s32 %v270_v4, %v267_v5  ;;  %vm275_vm0 = vcmp.lt.s32.totalorder %v271_v9, 1  ;;  %s290_s27 = scalar_lea.sflag [#allocation4], %s218_s7  ;;  %s520_s29 = scalar_lea.vmem %s757_s18, 128 }
  0x48   : > { %s826_s4 = smov (!%p233_p7, %s402_s4), 0  ;;  %p521_p6 = scmp.ne.s32.totalorder %s757_s18, %s520_s29 }
  0x49   : > { %s235_s6 = scalar_lea.vmem %s811_s1, %s826_s4  ;;  %vm276_vm1 = vcmp.lt.s32.totalorder %v272_v10, 1  ;;  %vm277_vm2 = vcmp.lt.s32.totalorder %v273_v11, 1  ;;  %vm278_vm3 = vcmp.lt.s32.totalorder %v274_v16, 1  ;;  %s630_s14 = smov [#allocation5]  }
  0x4a   : > { %v251_v13 = vld [vmem:[%s235_s6] sm:$0xff]  ;;  %v252_v14 = vld [vmem:[%s235_s6 + $0x8] sm:$0xff]  ;;  %v253_v15 = vld [vmem:[%s235_s6 + $0x10] sm:$0xff]  ;;  %p522_p4 = pnand %p521_p6, %p710_p12  ;;  %s524_s30 = sshll.u32 %s630_s14, 4  ;;  %s525_s30 = int_to_ptr.vmem [resolvable:$false] %s524_s30 }
  0x4b   : > { %v254_v17 = vld [vmem:[%s235_s6 + $0x18] sm:$0xff]  ;;  %v255_v18 = vsub.f32 %v247_v6, %v251_v13  ;;  %v256_v19 = vsub.f32 %v248_v7, %v252_v14  ;;  %v257_v20 = vsub.f32 %v249_v8, %v253_v15  ;;  %s526_s28 = scalar_lea.vmem %s525_s30, 256  ;;  %p527_p9 = scmp.lt.s32.totalorder %s757_s18, %s525_s30 }
  0x4c   : > { %v258_v21 = vsub.f32 %v250_v12, %v254_v17  ;;  %p523_p8 = pneg %p522_p4  ;;  %p528_p10 = scmp.lt.s32.totalorder %s526_s28, %s520_s29 }
  0x4d   : > { %v259_v22 = vmul.f32 %v255_v18, %v255_v18  ;;  %v260_v23 = vmul.f32 %v256_v19, %v256_v19  ;;  %v261_v24 = vmul.f32 %v257_v20, %v257_v20 }
  0x4e   : > { %v262_v25 = vmul.f32 %v258_v21, %v258_v21  ;;  %p529_p11 = por %p528_p10, %p527_p9 }
  0x4f   : > { %v279_v26 = vsel %vm275_vm0, %v259_v22, 0.0  ;;  %v280_v27 = vsel %vm276_vm1, %v260_v23, 0.0  ;;  %v281_v28 = vsel %vm277_vm2, %v261_v24, 0.0 }
  0x50   : > { %v284_v29 = vadd.f32 %v280_v27, %v279_v26  ;;  %v282_v30 = vsel %vm278_vm3, %v262_v25, 0.0  ;;  %p530_p1 = pnand %p529_p11, %p523_p8 }
  0x52   : > { %v285_v31 = vadd.f32 %v284_v29, %v281_v28 }
  0x54   : > { %v286_v32 = vadd.f32 %v285_v31, %v282_v30 }
  0x56   : > { %288 = vst [vmem:[%s220_s17] sm:$0xff] %v286_v32 }
  0x57   : > { %533 = shalt.err (!%p530_p1)
}
  0x58   : > { %s534_s3 = scalar_lea.hbm %s755_s23, 128  ;;  %s538_s5 = scalar_lea.hbm %s812_s2, 256 }
  0x59   : > { %p535_p2 = scmp.ne.s32.totalorder %s755_s23, %s534_s3  ;;  %p539_p7 = scmp.lt.u32.totalorder %s755_s23, %s812_s2 }
  0x5a   : > { %p540_p6 = scmp.lt.u32.totalorder %s538_s5, %s534_s3  ;;  %p542_p8 = scmp.lt.u32.totalorder %s534_s3, %s755_s23 }
  0x5b   : > { %p536_p3 = pnand %p535_p2, %p710_p12 }
  0x5c   : > { %p541_p4 = por %p540_p6, %p539_p7 }
  0x5d   : > { %p537_p5 = pneg %p536_p3 }
  0x5e   : > { %p543_p9 = por %p542_p8, %p541_p4 }
  0x60   : > { %p544_p10 = pnand %p543_p9, %p537_p5 }
  0x62   : > { %547 = shalt.err (!%p544_p10)
}
  0x63   : > { %410 = dma.vmem_to_hbm [thread:$0]  (%p710_p12), %s757_s18, 128, %s755_s23, %s290_s27  }
  0x64 PF: > { %s315_s8 = sand.u32 1, %s597_s9   ;;  %p413_p11 = pnand %p393_p0, %p714_p13 }
  0x65   : > { %s316_s12 = scalar_lea.sflag [#allocation4], %s315_s8 }
  0x66   : > { %589 = dma.done.wait (!%p413_p11), %s316_s12, 128  }
  0x67   : > { %591 = vsyncadd (!%p413_p11), %s316_s12, 4294967168  ;;  %s18_s16 = sadd.s32 1, %s625_s16   ;;  %s817_s9 = smov %s601_s10 }
  0x68   : > { %p15_p1 = scmp.ge.s32.totalorder %s18_s16, 4   ;;  %s818_s10 = smov %s605_s11 }
  0x69   : > { %s819_s11 = smov %s704_s24  ;;  %s820_s12 = smov %s613_s13 }
  0x6a   : > { %s800_s13 = smov 0   ;;  %s821_s14 = smov %s621_s15 }
  0x6b   : > { %s822_s15 = smov %s824_s19  ;;  %17 = sbr.rel (!%p15_p1) target bundleno = 7 (0x7), region = 80 }
  0x72   :  { %321 = vsyncpa [#allocation3], 1 }
  0x73   :  { %323 = vsyncpa [#allocation3 + $0x1], 1 }
  0x74   :  { %324 = vsyncpa [#allocation4], 1 }
  0x75   :  { %326 = vsyncpa [#allocation4 + $0x1], 1 }

</bundles_post_ra>
